<compile_context>
chip_gen: v5e
topology: v5e:2x2
jax: 0.10.0
libtpu: 0.0.40
codegen_flags: <defaults>
</compile_context>

<pallas_src>
import math
import functools

import jax
import jax.numpy as jnp
from jax import lax
from jax.experimental import pallas as pl
from jax.experimental.pallas import tpu as pltpu


def _vmem_limit_bytes():
    """Scoped-VMEM budget derived from the chip (≈48 MiB v7x, ≈96 MiB v5e/v6e)."""
    cap = 64 * 1024 * 1024
    try:
        info = pltpu.get_tpu_info()
        cap = int(getattr(info, "vmem_capacity_bytes", cap))
    except Exception:
        pass
    return max(32 * 1024 * 1024, min(cap * 3 // 4, 100 * 1024 * 1024))


def _choose_tile(dim, target, quantum):
    """Largest multiple of `quantum` that divides `dim` and is <= target, else full dim.

    Guarantees the returned tile either equals the full dim or satisfies the
    TPU (8, 128) block-shape alignment rule for the dim it is used on.
    """
    if dim <= target:
        return dim
    t = (target // quantum) * quantum
    while t >= quantum:
        if dim % t == 0:
            return t
        t -= quantum
    return dim


def _choose_attention_tq(S, D, heads, act_bytes, w_bytes, budget, tq_max=256):
    """Pick the largest query tile whose VMEM footprint fits the chip budget."""
    cands = sorted({t for t in (tq_max, 128, 64, 32, 16, 8) if t < S and S % t == 0},
                   reverse=True)
    if not cands:
        return S

    def est(tq):
        kv = 2 * 2 * S * D * act_bytes          # K, V blocks (double-buffered)
        qo = 2 * 2 * tq * D * act_bytes         # q in + attn out (double-buffered)
        w = 2 * heads * tq * S * w_bytes        # weights out block (double-buffered)
        tmp = 4 * tq * S * 4                    # s / e / wh f32 live temporaries + slack
        return kv + qo + w + tmp

    for t in cands:
        if est(t) <= int(budget * 0.8):
            return t
    return cands[-1]


# ---------------------------------------------------------------------------
# Kernel 1: tiled dense linear layer  y = x @ W_t + b   (W_t is (Din, Dout) bf16)
# ---------------------------------------------------------------------------
def _linear_kernel(x_ref, w_ref, b_ref, o_ref, acc_ref):
    # K-axis reduction with a resident f32 accumulator (init / finalize gated).
    @pl.when(pl.program_id(2) == 0)
    def _():
        acc_ref[...] = jnp.zeros_like(acc_ref)

    # bf16 MXU operands, f32 accumulation.
    acc_ref[...] += jnp.dot(
        x_ref[...].astype(jnp.bfloat16),
        w_ref[...].astype(jnp.bfloat16),
        preferred_element_type=jnp.float32,
    )

    @pl.when(pl.program_id(2) == pl.num_programs(2) - 1)
    def _():
        o_ref[...] = (acc_ref[...] + b_ref[...]).astype(o_ref.dtype)


def linear(x2d, w_t, b2d, *, out_dtype=None, tm=512, tn=256, tk=512):
    """x2d: (M, Din), w_t: (Din, Dout) [bf16], b2d: (1, Dout) [f32] -> (M, Dout)."""
    M, K = x2d.shape
    N = w_t.shape[1]
    out_dtype = x2d.dtype if out_dtype is None else out_dtype
    TM = _choose_tile(M, tm, 8)
    TN = _choose_tile(N, tn, 128)
    TK = _choose_tile(K, tk, 128)
    grid = (M // TM, N // TN, K // TK)
    return pl.pallas_call(
        _linear_kernel,
        out_shape=jax.ShapeDtypeStruct((M, N), out_dtype),
        grid=grid,
        in_specs=[
            pl.BlockSpec((TM, TK), lambda i, j, k: (i, k)),
            pl.BlockSpec((TK, TN), lambda i, j, k: (k, j)),
            pl.BlockSpec((1, TN), lambda i, j, k: (0, j)),
        ],
        out_specs=pl.BlockSpec((TM, TN), lambda i, j, k: (i, j)),
        scratch_shapes=[pltpu.VMEM((TM, TN), jnp.float32)],
        compiler_params=pltpu.CompilerParams(
            dimension_semantics=("parallel", "parallel", "arbitrary"),
            vmem_limit_bytes=_vmem_limit_bytes(),
        ),
    )(x2d, w_t, b2d)


# ---------------------------------------------------------------------------
# Kernel 2: attention over a query tile, all heads fused, (B, S, D) layout
# ---------------------------------------------------------------------------
def _attention_kernel(q_ref, k_ref, v_ref, o_ref, *maybe_w_ref, heads):
    # q_ref: (TQ, D), k_ref/v_ref: (S, D), o_ref: (TQ, D), w_ref: (H, TQ, S)
    # 1/sqrt(dk) is already folded into Wq/bq, so Q arrives pre-scaled.
    w_ref = maybe_w_ref[0] if maybe_w_ref else None
    q = q_ref[...].astype(jnp.bfloat16)
    k = k_ref[...].astype(jnp.bfloat16)
    v = v_ref[...].astype(jnp.bfloat16)
    d_model = q.shape[-1]
    dk = d_model // heads

    # Static per-head loop: head h lives in feature columns [h*dk, (h+1)*dk).
    # Each head's weights / output are stored immediately (no list + concat),
    # so the compiler does not keep several (TQ, S) f32 temporaries live
    # across heads.
    for h in range(heads):
        sl = slice(h * dk, (h + 1) * dk)
        qh = q[:, sl]                                  # (TQ, dk) bf16
        kh = k[:, sl]                                  # (S, dk)  bf16
        vh = v[:, sl]                                  # (S, dk)  bf16
        # Q_h @ K_h^T without materializing a transpose: contract last dims.
        s = lax.dot_general(
            qh, kh, (((1,), (1,)), ((), ())),
            preferred_element_type=jnp.float32,
        )                                              # (TQ, S) f32 scores
        # Softmax in f32; EUP approx reciprocal + two Newton steps (f32-exact).
        m = jnp.max(s, axis=-1, keepdims=True)
        e = jnp.exp(s - m)
        denom = jnp.sum(e, axis=-1, keepdims=True)     # (TQ, 1)
        inv = pl.reciprocal(denom, approx=True)
        inv = inv * (2.0 - denom * inv)
        inv = inv * (2.0 - denom * inv)
        wh = e * inv                                   # (TQ, S) softmax weights
        if w_ref is not None:
            w_ref[h] = wh.astype(w_ref.dtype)          # lane-dense (TQ, S) store
        o_ref[:, sl] = jnp.dot(
            wh.astype(jnp.bfloat16), vh, preferred_element_type=jnp.float32
        ).astype(o_ref.dtype)                          # (TQ, dk) direct slab write


def scaled_dot_product_attention(q, k, v, *, heads, return_weights=True,
                                 weights_dtype=jnp.bfloat16, tq_max=256):
    """q, k, v: (B, S, D) projected tensors -> (attn (B,S,D), weights (B,H,S,S) or None)."""
    B, S, D = q.shape
    budget = _vmem_limit_bytes()
    act_bytes = jnp.dtype(q.dtype).itemsize
    w_bytes = jnp.dtype(weights_dtype).itemsize if return_weights else 0
    TQ = _choose_attention_tq(S, D, heads, act_bytes, w_bytes, budget, tq_max=tq_max)
    grid = (S // TQ, B)   # query-tile axis first: better megacore split when B is small

    kernel = functools.partial(_attention_kernel, heads=heads)
    out_shapes = [jax.ShapeDtypeStruct((B, S, D), q.dtype)]
    out_specs = [pl.BlockSpec((None, TQ, D), lambda qi, b: (b, qi, 0))]
    if return_weights:
        out_shapes.append(jax.ShapeDtypeStruct((B, heads, S, S), weights_dtype))
        out_specs.append(pl.BlockSpec((None, heads, TQ, S), lambda qi, b: (b, 0, qi, 0)))

    res = pl.pallas_call(
        kernel,
        out_shape=out_shapes,
        grid=grid,
        in_specs=[
            pl.BlockSpec((None, TQ, D), lambda qi, b: (b, qi, 0)),
            pl.BlockSpec((None, S, D), lambda qi, b: (b, 0, 0)),
            pl.BlockSpec((None, S, D), lambda qi, b: (b, 0, 0)),
        ],
        out_specs=out_specs,
        compiler_params=pltpu.CompilerParams(
            dimension_semantics=("parallel", "parallel"),
            vmem_limit_bytes=budget,
        ),
    )(q, k, v)

    if return_weights:
        return res[0], res[1]
    return res[0], None


# ---------------------------------------------------------------------------
# MultiHeadAttention forward (all hot paths in Pallas, no XLA transposes)
# ---------------------------------------------------------------------------
def prepare_params(params, *, heads, compute_dtype=jnp.bfloat16):
    """One-time (outside jit) weight transposition + bf16 cast + bias reshape.

    1/sqrt(dk) is folded into Wq / bq here so the attention kernel never
    scales Q at runtime.
    """
    d_model = params["wq"].shape[0]
    scale = 1.0 / math.sqrt(d_model // heads)
    f32 = jnp.float32
    return {
        "wq_t": (params["wq"].T * scale).astype(compute_dtype),
        "bq": (params["bq"] * scale).reshape(1, -1).astype(f32),
        "wk_t": params["wk"].T.astype(compute_dtype),
        "bk": params["bk"].reshape(1, -1).astype(f32),
        "wv_t": params["wv"].T.astype(compute_dtype),
        "bv": params["bv"].reshape(1, -1).astype(f32),
        "wo_t": params["wo"].T.astype(compute_dtype),
        "bo": params["bo"].reshape(1, -1).astype(f32),
    }


def multi_head_attention(prepared, q, k, v, *, heads, return_weights=True):
    B, S, D = q.shape
    compute_dtype = prepared["wq_t"].dtype
    # Projections: (B*S, D) @ (D, D); reshape (B*S,D)<->(B,S,D) is free metadata.
    # Q/K/V are emitted in bf16 (halves the HBM round trip into attention).
    Q = linear(q.reshape(B * S, D), prepared["wq_t"], prepared["bq"],
               out_dtype=compute_dtype).reshape(B, S, D)
    K = linear(k.reshape(B * S, D), prepared["wk_t"], prepared["bk"],
               out_dtype=compute_dtype).reshape(B, S, D)
    V = linear(v.reshape(B * S, D), prepared["wv_t"], prepared["bv"],
               out_dtype=compute_dtype).reshape(B, S, D)

    # Head split / merge handled inside the kernel; output already (B, S, D).
    attn, attn_weights = scaled_dot_product_attention(
        Q, K, V, heads=heads, return_weights=return_weights)

    # dropout: identity in eval mode
    out = linear(attn.reshape(B * S, D), prepared["wo_t"], prepared["bo"],
                 out_dtype=q.dtype).reshape(B, S, D)
    if return_weights:
        return out, attn_weights
    return out


# ---------------------------------------------------------------------------
# Pure-JAX f32 reference for correctness checking
# ---------------------------------------------------------------------------
def reference_mha(params, q, k, v, *, heads):
    B, S, D = q.shape
    dk = D // heads

    def project(x, w, b):
        y = x @ w.T + b
        return y.reshape(B, S, heads, dk).transpose(0, 2, 1, 3)

    Q = project(q, params["wq"], params["bq"])
    K = project(k, params["wk"], params["bk"])
    V = project(v, params["wv"], params["bv"])
    scores = jnp.einsum("bhqd,bhkd->bhqk", Q, K) / math.sqrt(dk)
    w = jax.nn.softmax(scores, axis=-1)
    attn = jnp.einsum("bhqk,bhkd->bhqd", w, V)
    attn = attn.transpose(0, 2, 1, 3).reshape(B, S, D)
    out = attn @ params["wo"].T + params["bo"]
    return out, w


def init_params(key, d_model):
    # Deterministic synthetic init (PyTorch-Linear-like uniform bound).
    bound = 1.0 / math.sqrt(d_model)
    ks = jax.random.split(key, 8)
    u = lambda k, shape: jax.random.uniform(
        k, shape, jnp.float32, minval=-bound, maxval=bound
    )
    return {
        "wq": u(ks[0], (d_model, d_model)), "bq": u(ks[1], (d_model,)),
        "wk": u(ks[2], (d_model, d_model)), "bk": u(ks[3], (d_model,)),
        "wv": u(ks[4], (d_model, d_model)), "bv": u(ks[5], (d_model,)),
        "wo": u(ks[6], (d_model, d_model)), "bo": u(ks[7], (d_model,)),
    }


if __name__ == "__main__":
    B, S, D, H = 2, 8, 32, 4

    key = jax.random.PRNGKey(0)
    kp, kq, kk, kv = jax.random.split(key, 4)
    params = init_params(kp, D)
    q = jax.random.normal(kq, (B, S, D), jnp.float32)
    k = jax.random.normal(kk, (B, S, D), jnp.float32)
    v = jax.random.normal(kv, (B, S, D), jnp.float32)

    prepared = prepare_params(params, heads=H)   # transposed / bf16 once, outside jit
    fwd = jax.jit(functools.partial(multi_head_attention, heads=H))
    out, weights = fwd(prepared, q, k, v)
    jax.block_until_ready((out, weights))

    ref_out, ref_w = reference_mha(params, q, k, v, heads=H)
    assert out.shape == (B, S, D)
    assert weights.shape == (B, H, S, S)
    # bf16 MXU operands + bf16 weights output => compare at bf16-level tolerance.
    assert jnp.allclose(out, ref_out, atol=5e-2, rtol=5e-2), \
        float(jnp.max(jnp.abs(out - ref_out)))
    assert jnp.allclose(weights.astype(jnp.float32), ref_w, atol=5e-2, rtol=5e-2), \
        float(jnp.max(jnp.abs(weights.astype(jnp.float32) - ref_w)))

    print("KERNEL_OK")
</pallas_src>

<mosaic_0001>
module attributes {stable_mosaic.version = 11 : i64} {
  func.func @_linear_kernel(%arg0: i32, %arg1: i32, %arg2: i32, %arg3: memref<16x32xf32, #tpu.memory_space<vmem>>, %arg4: memref<32x32xbf16, #tpu.memory_space<vmem>>, %arg5: memref<1x32xf32, #tpu.memory_space<vmem>>, %arg6: memref<16x32xbf16, #tpu.memory_space<vmem>>, %arg7: memref<16x32xf32, #tpu.memory_space<vmem>>) attributes {dimension_semantics = [#tpu.dimension_semantics<parallel>, #tpu.dimension_semantics<parallel>, #tpu.dimension_semantics<arbitrary>], iteration_bounds = array<i64: 1, 1, 1>, scalar_prefetch = 0 : i64, scratch_operands = 1 : i64, tpu.core_type = #tpu.core_type<tc>, window_params = [{transform_indices = @transform_0, window_bounds = array<i64: 16, 32>}, {transform_indices = @transform_1, window_bounds = array<i64: 32, 32>}, {transform_indices = @transform_2, window_bounds = array<i64: 1, 32>}, {transform_indices = @transform_3, window_bounds = array<i64: 16, 32>}]} {
    %c0_i32 = arith.constant 0 : i32
    %0 = arith.cmpi eq, %arg2, %c0_i32 : i32
    %1 = arith.extui %0 : i1 to i32
    %c0_i32_0 = arith.constant 0 : i32
    %2 = arith.cmpi ne, %1, %c0_i32_0 : i32
    scf.if %2 {
      %cst_10 = arith.constant 0.000000e+00 : f32
      %13 = vector.broadcast %cst_10 : f32 to vector<16x32xf32>
      %c0_11 = arith.constant 0 : index
      %c0_12 = arith.constant 0 : index
      %14 = vector.load %arg7[%c0_11, %c0_12] : memref<16x32xf32, #tpu.memory_space<vmem>>, vector<16x32xf32>
      tpu.vector_store %arg7[%c0_11, %c0_12], %13 {strides = array<i32>} : memref<16x32xf32, #tpu.memory_space<vmem>>, vector<16x32xf32>,
    } else {
    }
    %c0 = arith.constant 0 : index
    %c0_1 = arith.constant 0 : index
    %3 = vector.load %arg7[%c0, %c0_1] : memref<16x32xf32, #tpu.memory_space<vmem>>, vector<16x32xf32>
    %c0_2 = arith.constant 0 : index
    %c0_3 = arith.constant 0 : index
    %4 = vector.load %arg3[%c0_2, %c0_3] : memref<16x32xf32, #tpu.memory_space<vmem>>, vector<16x32xf32>
    %5 = arith.truncf %4 : vector<16x32xf32> to vector<16x32xbf16>
    %c0_4 = arith.constant 0 : index
    %c0_5 = arith.constant 0 : index
    %6 = vector.load %arg4[%c0_4, %c0_5] : memref<32x32xbf16, #tpu.memory_space<vmem>>, vector<32x32xbf16>
    %cst = arith.constant dense<0.000000e+00> : vector<16x32xf32>
    %7 = tpu.matmul %5, %6, %cst {dimension_numbers = #tpu.dot_dimension_numbers<[1], [0], [0], [1], [0, 0, 1, 1], [], []>} : vector<16x32xbf16>, vector<32x32xbf16>, vector<16x32xf32> -> vector<16x32xf32>
    %8 = arith.addf %3, %7 : vector<16x32xf32>
    %c0_6 = arith.constant 0 : index
    %c0_7 = arith.constant 0 : index
    %9 = vector.load %arg7[%c0_6, %c0_7] : memref<16x32xf32, #tpu.memory_space<vmem>>, vector<16x32xf32>
    tpu.vector_store %arg7[%c0_6, %c0_7], %8 {strides = array<i32>} : memref<16x32xf32, #tpu.memory_space<vmem>>, vector<16x32xf32>,
    %c0_i32_8 = arith.constant 0 : i32
    %10 = arith.cmpi eq, %arg2, %c0_i32_8 : i32
    %11 = arith.extui %10 : i1 to i32
    %c0_i32_9 = arith.constant 0 : i32
    %12 = arith.cmpi ne, %11, %c0_i32_9 : i32
    scf.if %12 {
      %c0_10 = arith.constant 0 : index
      %c0_11 = arith.constant 0 : index
      %13 = vector.load %arg7[%c0_10, %c0_11] : memref<16x32xf32, #tpu.memory_space<vmem>>, vector<16x32xf32>
      %c0_12 = arith.constant 0 : index
      %c0_13 = arith.constant 0 : index
      %14 = vector.load %arg5[%c0_12, %c0_13] : memref<1x32xf32, #tpu.memory_space<vmem>>, vector<1x32xf32>
      %15 = vector.broadcast %14 : vector<1x32xf32> to vector<16x32xf32>
      %16 = arith.addf %13, %15 : vector<16x32xf32>
      %17 = arith.truncf %16 : vector<16x32xf32> to vector<16x32xbf16>
      %c0_14 = arith.constant 0 : index
      %c0_15 = arith.constant 0 : index
      %18 = vector.load %arg6[%c0_14, %c0_15] : memref<16x32xbf16, #tpu.memory_space<vmem>>, vector<16x32xbf16>
      tpu.vector_store %arg6[%c0_14, %c0_15], %17 {strides = array<i32>} : memref<16x32xbf16, #tpu.memory_space<vmem>>, vector<16x32xbf16>,
    } else {
    }
    return
  }
  func.func @transform_0(%arg0: i32, %arg1: i32, %arg2: i32) -> (i32, i32) {
    %c0_i32 = arith.constant 0 : i32
    return %arg0, %arg2 : i32, i32
  }
  func.func @transform_1(%arg0: i32, %arg1: i32, %arg2: i32) -> (i32, i32) {
    %c0_i32 = arith.constant 0 : i32
    return %arg2, %arg1 : i32, i32
  }
  func.func @transform_2(%arg0: i32, %arg1: i32, %arg2: i32) -> (i32, i32) {
    %c0_i32 = arith.constant 0 : i32
    %c0_i32_0 = arith.constant 0 : i32
    return %c0_i32, %arg1 : i32, i32
  }
  func.func @transform_3(%arg0: i32, %arg1: i32, %arg2: i32) -> (i32, i32) {
    %c0_i32 = arith.constant 0 : i32
    return %arg0, %arg1 : i32, i32
  }
}

module attributes {stable_mosaic.version = 11 : i64} {
  func.func @_linear_kernel(%arg0: i32, %arg1: i32, %arg2: i32, %arg3: memref<16x32xbf16, #tpu.memory_space<vmem>>, %arg4: memref<32x32xbf16, #tpu.memory_space<vmem>>, %arg5: memref<1x32xf32, #tpu.memory_space<vmem>>, %arg6: memref<16x32xf32, #tpu.memory_space<vmem>>, %arg7: memref<16x32xf32, #tpu.memory_space<vmem>>) attributes {dimension_semantics = [#tpu.dimension_semantics<parallel>, #tpu.dimension_semantics<parallel>, #tpu.dimension_semantics<arbitrary>], iteration_bounds = array<i64: 1, 1, 1>, scalar_prefetch = 0 : i64, scratch_operands = 1 : i64, tpu.core_type = #tpu.core_type<tc>, window_params = [{transform_indices = @transform_0, window_bounds = array<i64: 16, 32>}, {transform_indices = @transform_1, window_bounds = array<i64: 32, 32>}, {transform_indices = @transform_2, window_bounds = array<i64: 1, 32>}, {transform_indices = @transform_3, window_bounds = array<i64: 16, 32>}]} {
    %c0_i32 = arith.constant 0 : i32
    %0 = arith.cmpi eq, %arg2, %c0_i32 : i32
    %1 = arith.extui %0 : i1 to i32
    %c0_i32_0 = arith.constant 0 : i32
    %2 = arith.cmpi ne, %1, %c0_i32_0 : i32
    scf.if %2 {
      %cst_10 = arith.constant 0.000000e+00 : f32
      %12 = vector.broadcast %cst_10 : f32 to vector<16x32xf32>
      %c0_11 = arith.constant 0 : index
      %c0_12 = arith.constant 0 : index
      %13 = vector.load %arg7[%c0_11, %c0_12] : memref<16x32xf32, #tpu.memory_space<vmem>>, vector<16x32xf32>
      tpu.vector_store %arg7[%c0_11, %c0_12], %12 {strides = array<i32>} : memref<16x32xf32, #tpu.memory_space<vmem>>, vector<16x32xf32>,
    } else {
    }
    %c0 = arith.constant 0 : index
    %c0_1 = arith.constant 0 : index
    %3 = vector.load %arg7[%c0, %c0_1] : memref<16x32xf32, #tpu.memory_space<vmem>>, vector<16x32xf32>
    %c0_2 = arith.constant 0 : index
    %c0_3 = arith.constant 0 : index
    %4 = vector.load %arg3[%c0_2, %c0_3] : memref<16x32xbf16, #tpu.memory_space<vmem>>, vector<16x32xbf16>
    %c0_4 = arith.constant 0 : index
    %c0_5 = arith.constant 0 : index
    %5 = vector.load %arg4[%c0_4, %c0_5] : memref<32x32xbf16, #tpu.memory_space<vmem>>, vector<32x32xbf16>
    %cst = arith.constant dense<0.000000e+00> : vector<16x32xf32>
    %6 = tpu.matmul %4, %5, %cst {dimension_numbers = #tpu.dot_dimension_numbers<[1], [0], [0], [1], [0, 0, 1, 1], [], []>} : vector<16x32xbf16>, vector<32x32xbf16>, vector<16x32xf32> -> vector<16x32xf32>
    %7 = arith.addf %3, %6 : vector<16x32xf32>
    %c0_6 = arith.constant 0 : index
    %c0_7 = arith.constant 0 : index
    %8 = vector.load %arg7[%c0_6, %c0_7] : memref<16x32xf32, #tpu.memory_space<vmem>>, vector<16x32xf32>
    tpu.vector_store %arg7[%c0_6, %c0_7], %7 {strides = array<i32>} : memref<16x32xf32, #tpu.memory_space<vmem>>, vector<16x32xf32>,
    %c0_i32_8 = arith.constant 0 : i32
    %9 = arith.cmpi eq, %arg2, %c0_i32_8 : i32
    %10 = arith.extui %9 : i1 to i32
    %c0_i32_9 = arith.constant 0 : i32
    %11 = arith.cmpi ne, %10, %c0_i32_9 : i32
    scf.if %11 {
      %c0_10 = arith.constant 0 : index
      %c0_11 = arith.constant 0 : index
      %12 = vector.load %arg7[%c0_10, %c0_11] : memref<16x32xf32, #tpu.memory_space<vmem>>, vector<16x32xf32>
      %c0_12 = arith.constant 0 : index
      %c0_13 = arith.constant 0 : index
      %13 = vector.load %arg5[%c0_12, %c0_13] : memref<1x32xf32, #tpu.memory_space<vmem>>, vector<1x32xf32>
      %14 = vector.broadcast %13 : vector<1x32xf32> to vector<16x32xf32>
      %15 = arith.addf %12, %14 : vector<16x32xf32>
      %c0_14 = arith.constant 0 : index
      %c0_15 = arith.constant 0 : index
      %16 = vector.load %arg6[%c0_14, %c0_15] : memref<16x32xf32, #tpu.memory_space<vmem>>, vector<16x32xf32>
      tpu.vector_store %arg6[%c0_14, %c0_15], %15 {strides = array<i32>} : memref<16x32xf32, #tpu.memory_space<vmem>>, vector<16x32xf32>,
    } else {
    }
    return
  }
  func.func @transform_0(%arg0: i32, %arg1: i32, %arg2: i32) -> (i32, i32) {
    %c0_i32 = arith.constant 0 : i32
    return %arg0, %arg2 : i32, i32
  }
  func.func @transform_1(%arg0: i32, %arg1: i32, %arg2: i32) -> (i32, i32) {
    %c0_i32 = arith.constant 0 : i32
    return %arg2, %arg1 : i32, i32
  }
  func.func @transform_2(%arg0: i32, %arg1: i32, %arg2: i32) -> (i32, i32) {
    %c0_i32 = arith.constant 0 : i32
    %c0_i32_0 = arith.constant 0 : i32
    return %c0_i32, %arg1 : i32, i32
  }
  func.func @transform_3(%arg0: i32, %arg1: i32, %arg2: i32) -> (i32, i32) {
    %c0_i32 = arith.constant 0 : i32
    return %arg0, %arg1 : i32, i32
  }
}

module attributes {stable_mosaic.version = 11 : i64} {
  func.func @_linear_kernel(%arg0: i32, %arg1: i32, %arg2: i32, %arg3: memref<16x32xf32, #tpu.memory_space<vmem>>, %arg4: memref<32x32xbf16, #tpu.memory_space<vmem>>, %arg5: memref<1x32xf32, #tpu.memory_space<vmem>>, %arg6: memref<16x32xbf16, #tpu.memory_space<vmem>>, %arg7: memref<16x32xf32, #tpu.memory_space<vmem>>) attributes {dimension_semantics = [#tpu.dimension_semantics<parallel>, #tpu.dimension_semantics<parallel>, #tpu.dimension_semantics<arbitrary>], iteration_bounds = array<i64: 1, 1, 1>, scalar_prefetch = 0 : i64, scratch_operands = 1 : i64, tpu.core_type = #tpu.core_type<tc>, window_params = [{transform_indices = @transform_0, window_bounds = array<i64: 16, 32>}, {transform_indices = @transform_1, window_bounds = array<i64: 32, 32>}, {transform_indices = @transform_2, window_bounds = array<i64: 1, 32>}, {transform_indices = @transform_3, window_bounds = array<i64: 16, 32>}]} {
    %c0_i32 = arith.constant 0 : i32
    %0 = arith.cmpi eq, %arg2, %c0_i32 : i32
    %1 = arith.extui %0 : i1 to i32
    %c0_i32_0 = arith.constant 0 : i32
    %2 = arith.cmpi ne, %1, %c0_i32_0 : i32
    scf.if %2 {
      %cst_10 = arith.constant 0.000000e+00 : f32
      %13 = vector.broadcast %cst_10 : f32 to vector<16x32xf32>
      %c0_11 = arith.constant 0 : index
      %c0_12 = arith.constant 0 : index
      %14 = vector.load %arg7[%c0_11, %c0_12] : memref<16x32xf32, #tpu.memory_space<vmem>>, vector<16x32xf32>
      tpu.vector_store %arg7[%c0_11, %c0_12], %13 {strides = array<i32>} : memref<16x32xf32, #tpu.memory_space<vmem>>, vector<16x32xf32>,
    } else {
    }
    %c0 = arith.constant 0 : index
    %c0_1 = arith.constant 0 : index
    %3 = vector.load %arg7[%c0, %c0_1] : memref<16x32xf32, #tpu.memory_space<vmem>>, vector<16x32xf32>
    %c0_2 = arith.constant 0 : index
    %c0_3 = arith.constant 0 : index
    %4 = vector.load %arg3[%c0_2, %c0_3] : memref<16x32xf32, #tpu.memory_space<vmem>>, vector<16x32xf32>
    %5 = arith.truncf %4 : vector<16x32xf32> to vector<16x32xbf16>
    %c0_4 = arith.constant 0 : index
    %c0_5 = arith.constant 0 : index
    %6 = vector.load %arg4[%c0_4, %c0_5] : memref<32x32xbf16, #tpu.memory_space<vmem>>, vector<32x32xbf16>
    %cst = arith.constant dense<0.000000e+00> : vector<16x32xf32>
    %7 = tpu.matmul %5, %6, %cst {dimension_numbers = #tpu.dot_dimension_numbers<[1], [0], [0], [1], [0, 0, 1, 1], [], []>} : vector<16x32xbf16>, vector<32x32xbf16>, vector<16x32xf32> -> vector<16x32xf32>
    %8 = arith.addf %3, %7 : vector<16x32xf32>
    %c0_6 = arith.constant 0 : index
    %c0_7 = arith.constant 0 : index
    %9 = vector.load %arg7[%c0_6, %c0_7] : memref<16x32xf32, #tpu.memory_space<vmem>>, vector<16x32xf32>
    tpu.vector_store %arg7[%c0_6, %c0_7], %8 {strides = array<i32>} : memref<16x32xf32, #tpu.memory_space<vmem>>, vector<16x32xf32>,
    %c0_i32_8 = arith.constant 0 : i32
    %10 = arith.cmpi eq, %arg2, %c0_i32_8 : i32
    %11 = arith.extui %10 : i1 to i32
    %c0_i32_9 = arith.constant 0 : i32
    %12 = arith.cmpi ne, %11, %c0_i32_9 : i32
    scf.if %12 {
      %c0_10 = arith.constant 0 : index
      %c0_11 = arith.constant 0 : index
      %13 = vector.load %arg7[%c0_10, %c0_11] : memref<16x32xf32, #tpu.memory_space<vmem>>, vector<16x32xf32>
      %c0_12 = arith.constant 0 : index
      %c0_13 = arith.constant 0 : index
      %14 = vector.load %arg5[%c0_12, %c0_13] : memref<1x32xf32, #tpu.memory_space<vmem>>, vector<1x32xf32>
      %15 = vector.broadcast %14 : vector<1x32xf32> to vector<16x32xf32>
      %16 = arith.addf %13, %15 : vector<16x32xf32>
      %17 = arith.truncf %16 : vector<16x32xf32> to vector<16x32xbf16>
      %c0_14 = arith.constant 0 : index
      %c0_15 = arith.constant 0 : index
      %18 = vector.load %arg6[%c0_14, %c0_15] : memref<16x32xbf16, #tpu.memory_space<vmem>>, vector<16x32xbf16>
      tpu.vector_store %arg6[%c0_14, %c0_15], %17 {strides = array<i32>} : memref<16x32xbf16, #tpu.memory_space<vmem>>, vector<16x32xbf16>,
    } else {
    }
    return
  }
  func.func @transform_0(%arg0: i32, %arg1: i32, %arg2: i32) -> (i32, i32) {
    %c0_i32 = arith.constant 0 : i32
    return %arg0, %arg2 : i32, i32
  }
  func.func @transform_1(%arg0: i32, %arg1: i32, %arg2: i32) -> (i32, i32) {
    %c0_i32 = arith.constant 0 : i32
    return %arg2, %arg1 : i32, i32
  }
  func.func @transform_2(%arg0: i32, %arg1: i32, %arg2: i32) -> (i32, i32) {
    %c0_i32 = arith.constant 0 : i32
    %c0_i32_0 = arith.constant 0 : i32
    return %c0_i32, %arg1 : i32, i32
  }
  func.func @transform_3(%arg0: i32, %arg1: i32, %arg2: i32) -> (i32, i32) {
    %c0_i32 = arith.constant 0 : i32
    return %arg0, %arg1 : i32, i32
  }
}

module attributes {stable_mosaic.version = 11 : i64} {
  func.func @_attention_kernel(%arg0: i32, %arg1: i32, %arg2: memref<1x8x32xbf16, #tpu.memory_space<vmem>>, %arg3: memref<1x8x32xbf16, #tpu.memory_space<vmem>>, %arg4: memref<1x8x32xbf16, #tpu.memory_space<vmem>>, %arg5: memref<1x8x32xbf16, #tpu.memory_space<vmem>>, %arg6: memref<1x4x8x8xbf16, #tpu.memory_space<vmem>>) attributes {dimension_semantics = [#tpu.dimension_semantics<parallel>, #tpu.dimension_semantics<parallel>], iteration_bounds = array<i64: 1, 2>, scalar_prefetch = 0 : i64, scratch_operands = 0 : i64, tpu.core_type = #tpu.core_type<tc>, window_params = [{transform_indices = @transform_0, window_bounds = array<i64: 1, 8, 32>}, {transform_indices = @transform_1, window_bounds = array<i64: 1, 8, 32>}, {transform_indices = @transform_2, window_bounds = array<i64: 1, 8, 32>}, {transform_indices = @transform_3, window_bounds = array<i64: 1, 8, 32>}, {transform_indices = @transform_4, window_bounds = array<i64: 1, 4, 8, 8>}]} {
    %c0 = arith.constant 0 : index
    %c0_0 = arith.constant 0 : index
    %c0_1 = arith.constant 0 : index
    %0 = vector.load %arg2[%c0, %c0_0, %c0_1] : memref<1x8x32xbf16, #tpu.memory_space<vmem>>, vector<1x8x32xbf16>
    %1 = vector.shape_cast %0 : vector<1x8x32xbf16> to vector<8x32xbf16>
    %c0_2 = arith.constant 0 : index
    %c0_3 = arith.constant 0 : index
    %c0_4 = arith.constant 0 : index
    %2 = vector.load %arg3[%c0_2, %c0_3, %c0_4] : memref<1x8x32xbf16, #tpu.memory_space<vmem>>, vector<1x8x32xbf16>
    %3 = vector.shape_cast %2 : vector<1x8x32xbf16> to vector<8x32xbf16>
    %c0_5 = arith.constant 0 : index
    %c0_6 = arith.constant 0 : index
    %c0_7 = arith.constant 0 : index
    %4 = vector.load %arg4[%c0_5, %c0_6, %c0_7] : memref<1x8x32xbf16, #tpu.memory_space<vmem>>, vector<1x8x32xbf16>
    %5 = vector.shape_cast %4 : vector<1x8x32xbf16> to vector<8x32xbf16>
    %6 = vector.extract_strided_slice %1 {offsets = [0, 0], sizes = [8, 8], strides = [1, 1]} : vector<8x32xbf16> to vector<8x8xbf16>
    %7 = vector.extract_strided_slice %3 {offsets = [0, 0], sizes = [8, 8], strides = [1, 1]} : vector<8x32xbf16> to vector<8x8xbf16>
    %8 = vector.extract_strided_slice %5 {offsets = [0, 0], sizes = [8, 8], strides = [1, 1]} : vector<8x32xbf16> to vector<8x8xbf16>
    %cst = arith.constant dense<0.000000e+00> : vector<8x8xf32>
    %9 = tpu.matmul %6, %7, %cst {dimension_numbers = #tpu.dot_dimension_numbers<[1], [1], [0], [0], [0, 0, 1, 0], [], []>} : vector<8x8xbf16>, vector<8x8xbf16>, vector<8x8xf32> -> vector<8x8xf32>
    %cst_8 = arith.constant dense<0xFF800000> : vector<8xf32>
    %10 = vector.multi_reduction <maximumf>, %9, %cst_8 [1] : vector<8x8xf32> to vector<8xf32>
    %11 = vector.shape_cast %10 : vector<8xf32> to vector<8x1xf32>
    %12 = vector.broadcast %11 : vector<8x1xf32> to vector<8x8xf32>
    %13 = arith.subf %9, %12 : vector<8x8xf32>
    %14 = math.exp %13 : vector<8x8xf32>
    %cst_9 = arith.constant dense<0.000000e+00> : vector<8xf32>
    %15 = vector.multi_reduction <add>, %14, %cst_9 [1] : vector<8x8xf32> to vector<8xf32>
    %16 = vector.shape_cast %15 : vector<8xf32> to vector<8x1xf32>
    %17 = tpu.reciprocal %16 {approx = true} : vector<8x1xf32> -> vector<8x1xf32>
    %18 = arith.mulf %16, %17 : vector<8x1xf32>
    %cst_10 = arith.constant 2.000000e+00 : f32
    %19 = vector.broadcast %cst_10 : f32 to vector<8x1xf32>
    %20 = arith.subf %19, %18 : vector<8x1xf32>
    %21 = arith.mulf %17, %20 : vector<8x1xf32>
    %22 = arith.mulf %16, %21 : vector<8x1xf32>
    %cst_11 = arith.constant 2.000000e+00 : f32
    %23 = vector.broadcast %cst_11 : f32 to vector<8x1xf32>
    %24 = arith.subf %23, %22 : vector<8x1xf32>
    %25 = arith.mulf %21, %24 : vector<8x1xf32>
    %26 = vector.broadcast %25 : vector<8x1xf32> to vector<8x8xf32>
    %27 = arith.mulf %14, %26 : vector<8x8xf32>
    %28 = arith.truncf %27 : vector<8x8xf32> to vector<8x8xbf16>
    %c0_12 = arith.constant 0 : index
    %c0_13 = arith.constant 0 : index
    %c0_14 = arith.constant 0 : index
    %c0_15 = arith.constant 0 : index
    %29 = vector.load %arg6[%c0_12, %c0_13, %c0_14, %c0_15] : memref<1x4x8x8xbf16, #tpu.memory_space<vmem>>, vector<1x1x8x8xbf16>
    %30 = vector.shape_cast %29 : vector<1x1x8x8xbf16> to vector<8x8xbf16>
    %31 = vector.shape_cast %28 : vector<8x8xbf16> to vector<1x1x8x8xbf16>
    tpu.vector_store %arg6[%c0_12, %c0_13, %c0_14, %c0_15], %31 {strides = array<i32>} : memref<1x4x8x8xbf16, #tpu.memory_space<vmem>>, vector<1x1x8x8xbf16>,
    %32 = arith.truncf %27 : vector<8x8xf32> to vector<8x8xbf16>
    %cst_16 = arith.constant dense<0.000000e+00> : vector<8x8xf32>
    %33 = tpu.matmul %32, %8, %cst_16 {dimension_numbers = #tpu.dot_dimension_numbers<[1], [0], [0], [1], [0, 0, 1, 1], [], []>} : vector<8x8xbf16>, vector<8x8xbf16>, vector<8x8xf32> -> vector<8x8xf32>
    %34 = arith.truncf %33 : vector<8x8xf32> to vector<8x8xbf16>
    %c0_17 = arith.constant 0 : index
    %c0_18 = arith.constant 0 : index
    %c0_19 = arith.constant 0 : index
    %35 = vector.load %arg5[%c0_17, %c0_18, %c0_19] : memref<1x8x32xbf16, #tpu.memory_space<vmem>>, vector<1x8x8xbf16>
    %36 = vector.shape_cast %35 : vector<1x8x8xbf16> to vector<8x8xbf16>
    %37 = vector.shape_cast %34 : vector<8x8xbf16> to vector<1x8x8xbf16>
    tpu.vector_store %arg5[%c0_17, %c0_18, %c0_19], %37 {strides = array<i32>} : memref<1x8x32xbf16, #tpu.memory_space<vmem>>, vector<1x8x8xbf16>,
    %38 = vector.extract_strided_slice %1 {offsets = [0, 8], sizes = [8, 8], strides = [1, 1]} : vector<8x32xbf16> to vector<8x8xbf16>
    %39 = vector.extract_strided_slice %3 {offsets = [0, 8], sizes = [8, 8], strides = [1, 1]} : vector<8x32xbf16> to vector<8x8xbf16>
    %40 = vector.extract_strided_slice %5 {offsets = [0, 8], sizes = [8, 8], strides = [1, 1]} : vector<8x32xbf16> to vector<8x8xbf16>
    %cst_20 = arith.constant dense<0.000000e+00> : vector<8x8xf32>
    %41 = tpu.matmul %38, %39, %cst_20 {dimension_numbers = #tpu.dot_dimension_numbers<[1], [1], [0], [0], [0, 0, 1, 0], [], []>} : vector<8x8xbf16>, vector<8x8xbf16>, vector<8x8xf32> -> vector<8x8xf32>
    %cst_21 = arith.constant dense<0xFF800000> : vector<8xf32>
    %42 = vector.multi_reduction <maximumf>, %41, %cst_21 [1] : vector<8x8xf32> to vector<8xf32>
    %43 = vector.shape_cast %42 : vector<8xf32> to vector<8x1xf32>
    %44 = vector.broadcast %43 : vector<8x1xf32> to vector<8x8xf32>
    %45 = arith.subf %41, %44 : vector<8x8xf32>
    %46 = math.exp %45 : vector<8x8xf32>
    %cst_22 = arith.constant dense<0.000000e+00> : vector<8xf32>
    %47 = vector.multi_reduction <add>, %46, %cst_22 [1] : vector<8x8xf32> to vector<8xf32>
    %48 = vector.shape_cast %47 : vector<8xf32> to vector<8x1xf32>
    %49 = tpu.reciprocal %48 {approx = true} : vector<8x1xf32> -> vector<8x1xf32>
    %50 = arith.mulf %48, %49 : vector<8x1xf32>
    %cst_23 = arith.constant 2.000000e+00 : f32
    %51 = vector.broadcast %cst_23 : f32 to vector<8x1xf32>
    %52 = arith.subf %51, %50 : vector<8x1xf32>
    %53 = arith.mulf %49, %52 : vector<8x1xf32>
    %54 = arith.mulf %48, %53 : vector<8x1xf32>
    %cst_24 = arith.constant 2.000000e+00 : f32
    %55 = vector.broadcast %cst_24 : f32 to vector<8x1xf32>
    %56 = arith.subf %55, %54 : vector<8x1xf32>
    %57 = arith.mulf %53, %56 : vector<8x1xf32>
    %58 = vector.broadcast %57 : vector<8x1xf32> to vector<8x8xf32>
    %59 = arith.mulf %46, %58 : vector<8x8xf32>
    %60 = arith.truncf %59 : vector<8x8xf32> to vector<8x8xbf16>
    %c0_25 = arith.constant 0 : index
    %c1 = arith.constant 1 : index
    %c0_26 = arith.constant 0 : index
    %c0_27 = arith.constant 0 : index
    %61 = vector.load %arg6[%c0_25, %c1, %c0_26, %c0_27] : memref<1x4x8x8xbf16, #tpu.memory_space<vmem>>, vector<1x1x8x8xbf16>
    %62 = vector.shape_cast %61 : vector<1x1x8x8xbf16> to vector<8x8xbf16>
    %63 = vector.shape_cast %60 : vector<8x8xbf16> to vector<1x1x8x8xbf16>
    tpu.vector_store %arg6[%c0_25, %c1, %c0_26, %c0_27], %63 {strides = array<i32>} : memref<1x4x8x8xbf16, #tpu.memory_space<vmem>>, vector<1x1x8x8xbf16>,
    %64 = arith.truncf %59 : vector<8x8xf32> to vector<8x8xbf16>
    %cst_28 = arith.constant dense<0.000000e+00> : vector<8x8xf32>
    %65 = tpu.matmul %64, %40, %cst_28 {dimension_numbers = #tpu.dot_dimension_numbers<[1], [0], [0], [1], [0, 0, 1, 1], [], []>} : vector<8x8xbf16>, vector<8x8xbf16>, vector<8x8xf32> -> vector<8x8xf32>
    %66 = arith.truncf %65 : vector<8x8xf32> to vector<8x8xbf16>
    %c0_29 = arith.constant 0 : index
    %c0_30 = arith.constant 0 : index
    %c8 = arith.constant 8 : index
    %67 = vector.load %arg5[%c0_29, %c0_30, %c8] : memref<1x8x32xbf16, #tpu.memory_space<vmem>>, vector<1x8x8xbf16>
    %68 = vector.shape_cast %67 : vector<1x8x8xbf16> to vector<8x8xbf16>
    %69 = vector.shape_cast %66 : vector<8x8xbf16> to vector<1x8x8xbf16>
    tpu.vector_store %arg5[%c0_29, %c0_30, %c8], %69 {strides = array<i32>} : memref<1x8x32xbf16, #tpu.memory_space<vmem>>, vector<1x8x8xbf16>,
    %70 = vector.extract_strided_slice %1 {offsets = [0, 16], sizes = [8, 8], strides = [1, 1]} : vector<8x32xbf16> to vector<8x8xbf16>
    %71 = vector.extract_strided_slice %3 {offsets = [0, 16], sizes = [8, 8], strides = [1, 1]} : vector<8x32xbf16> to vector<8x8xbf16>
    %72 = vector.extract_strided_slice %5 {offsets = [0, 16], sizes = [8, 8], strides = [1, 1]} : vector<8x32xbf16> to vector<8x8xbf16>
    %cst_31 = arith.constant dense<0.000000e+00> : vector<8x8xf32>
    %73 = tpu.matmul %70, %71, %cst_31 {dimension_numbers = #tpu.dot_dimension_numbers<[1], [1], [0], [0], [0, 0, 1, 0], [], []>} : vector<8x8xbf16>, vector<8x8xbf16>, vector<8x8xf32> -> vector<8x8xf32>
    %cst_32 = arith.constant dense<0xFF800000> : vector<8xf32>
    %74 = vector.multi_reduction <maximumf>, %73, %cst_32 [1] : vector<8x8xf32> to vector<8xf32>
    %75 = vector.shape_cast %74 : vector<8xf32> to vector<8x1xf32>
    %76 = vector.broadcast %75 : vector<8x1xf32> to vector<8x8xf32>
    %77 = arith.subf %73, %76 : vector<8x8xf32>
    %78 = math.exp %77 : vector<8x8xf32>
    %cst_33 = arith.constant dense<0.000000e+00> : vector<8xf32>
    %79 = vector.multi_reduction <add>, %78, %cst_33 [1] : vector<8x8xf32> to vector<8xf32>
    %80 = vector.shape_cast %79 : vector<8xf32> to vector<8x1xf32>
    %81 = tpu.reciprocal %80 {approx = true} : vector<8x1xf32> -> vector<8x1xf32>
    %82 = arith.mulf %80, %81 : vector<8x1xf32>
    %cst_34 = arith.constant 2.000000e+00 : f32
    %83 = vector.broadcast %cst_34 : f32 to vector<8x1xf32>
    %84 = arith.subf %83, %82 : vector<8x1xf32>
    %85 = arith.mulf %81, %84 : vector<8x1xf32>
    %86 = arith.mulf %80, %85 : vector<8x1xf32>
    %cst_35 = arith.constant 2.000000e+00 : f32
    %87 = vector.broadcast %cst_35 : f32 to vector<8x1xf32>
    %88 = arith.subf %87, %86 : vector<8x1xf32>
    %89 = arith.mulf %85, %88 : vector<8x1xf32>
    %90 = vector.broadcast %89 : vector<8x1xf32> to vector<8x8xf32>
    %91 = arith.mulf %78, %90 : vector<8x8xf32>
    %92 = arith.truncf %91 : vector<8x8xf32> to vector<8x8xbf16>
    %c0_36 = arith.constant 0 : index
    %c2 = arith.constant 2 : index
    %c0_37 = arith.constant 0 : index
    %c0_38 = arith.constant 0 : index
    %93 = vector.load %arg6[%c0_36, %c2, %c0_37, %c0_38] : memref<1x4x8x8xbf16, #tpu.memory_space<vmem>>, vector<1x1x8x8xbf16>
    %94 = vector.shape_cast %93 : vector<1x1x8x8xbf16> to vector<8x8xbf16>
    %95 = vector.shape_cast %92 : vector<8x8xbf16> to vector<1x1x8x8xbf16>
    tpu.vector_store %arg6[%c0_36, %c2, %c0_37, %c0_38], %95 {strides = array<i32>} : memref<1x4x8x8xbf16, #tpu.memory_space<vmem>>, vector<1x1x8x8xbf16>,
    %96 = arith.truncf %91 : vector<8x8xf32> to vector<8x8xbf16>
    %cst_39 = arith.constant dense<0.000000e+00> : vector<8x8xf32>
    %97 = tpu.matmul %96, %72, %cst_39 {dimension_numbers = #tpu.dot_dimension_numbers<[1], [0], [0], [1], [0, 0, 1, 1], [], []>} : vector<8x8xbf16>, vector<8x8xbf16>, vector<8x8xf32> -> vector<8x8xf32>
    %98 = arith.truncf %97 : vector<8x8xf32> to vector<8x8xbf16>
    %c0_40 = arith.constant 0 : index
    %c0_41 = arith.constant 0 : index
    %c16 = arith.constant 16 : index
    %99 = vector.load %arg5[%c0_40, %c0_41, %c16] : memref<1x8x32xbf16, #tpu.memory_space<vmem>>, vector<1x8x8xbf16>
    %100 = vector.shape_cast %99 : vector<1x8x8xbf16> to vector<8x8xbf16>
    %101 = vector.shape_cast %98 : vector<8x8xbf16> to vector<1x8x8xbf16>
    tpu.vector_store %arg5[%c0_40, %c0_41, %c16], %101 {strides = array<i32>} : memref<1x8x32xbf16, #tpu.memory_space<vmem>>, vector<1x8x8xbf16>,
    %102 = vector.extract_strided_slice %1 {offsets = [0, 24], sizes = [8, 8], strides = [1, 1]} : vector<8x32xbf16> to vector<8x8xbf16>
    %103 = vector.extract_strided_slice %3 {offsets = [0, 24], sizes = [8, 8], strides = [1, 1]} : vector<8x32xbf16> to vector<8x8xbf16>
    %104 = vector.extract_strided_slice %5 {offsets = [0, 24], sizes = [8, 8], strides = [1, 1]} : vector<8x32xbf16> to vector<8x8xbf16>
    %cst_42 = arith.constant dense<0.000000e+00> : vector<8x8xf32>
    %105 = tpu.matmul %102, %103, %cst_42 {dimension_numbers = #tpu.dot_dimension_numbers<[1], [1], [0], [0], [0, 0, 1, 0], [], []>} : vector<8x8xbf16>, vector<8x8xbf16>, vector<8x8xf32> -> vector<8x8xf32>
    %cst_43 = arith.constant dense<0xFF800000> : vector<8xf32>
    %106 = vector.multi_reduction <maximumf>, %105, %cst_43 [1] : vector<8x8xf32> to vector<8xf32>
    %107 = vector.shape_cast %106 : vector<8xf32> to vector<8x1xf32>
    %108 = vector.broadcast %107 : vector<8x1xf32> to vector<8x8xf32>
    %109 = arith.subf %105, %108 : vector<8x8xf32>
    %110 = math.exp %109 : vector<8x8xf32>
    %cst_44 = arith.constant dense<0.000000e+00> : vector<8xf32>
    %111 = vector.multi_reduction <add>, %110, %cst_44 [1] : vector<8x8xf32> to vector<8xf32>
    %112 = vector.shape_cast %111 : vector<8xf32> to vector<8x1xf32>
    %113 = tpu.reciprocal %112 {approx = true} : vector<8x1xf32> -> vector<8x1xf32>
    %114 = arith.mulf %112, %113 : vector<8x1xf32>
    %cst_45 = arith.constant 2.000000e+00 : f32
    %115 = vector.broadcast %cst_45 : f32 to vector<8x1xf32>
    %116 = arith.subf %115, %114 : vector<8x1xf32>
    %117 = arith.mulf %113, %116 : vector<8x1xf32>
    %118 = arith.mulf %112, %117 : vector<8x1xf32>
    %cst_46 = arith.constant 2.000000e+00 : f32
    %119 = vector.broadcast %cst_46 : f32 to vector<8x1xf32>
    %120 = arith.subf %119, %118 : vector<8x1xf32>
    %121 = arith.mulf %117, %120 : vector<8x1xf32>
    %122 = vector.broadcast %121 : vector<8x1xf32> to vector<8x8xf32>
    %123 = arith.mulf %110, %122 : vector<8x8xf32>
    %124 = arith.truncf %123 : vector<8x8xf32> to vector<8x8xbf16>
    %c0_47 = arith.constant 0 : index
    %c3 = arith.constant 3 : index
    %c0_48 = arith.constant 0 : index
    %c0_49 = arith.constant 0 : index
    %125 = vector.load %arg6[%c0_47, %c3, %c0_48, %c0_49] : memref<1x4x8x8xbf16, #tpu.memory_space<vmem>>, vector<1x1x8x8xbf16>
    %126 = vector.shape_cast %125 : vector<1x1x8x8xbf16> to vector<8x8xbf16>
    %127 = vector.shape_cast %124 : vector<8x8xbf16> to vector<1x1x8x8xbf16>
    tpu.vector_store %arg6[%c0_47, %c3, %c0_48, %c0_49], %127 {strides = array<i32>} : memref<1x4x8x8xbf16, #tpu.memory_space<vmem>>, vector<1x1x8x8xbf16>,
    %128 = arith.truncf %123 : vector<8x8xf32> to vector<8x8xbf16>
    %cst_50 = arith.constant dense<0.000000e+00> : vector<8x8xf32>
    %129 = tpu.matmul %128, %104, %cst_50 {dimension_numbers = #tpu.dot_dimension_numbers<[1], [0], [0], [1], [0, 0, 1, 1], [], []>} : vector<8x8xbf16>, vector<8x8xbf16>, vector<8x8xf32> -> vector<8x8xf32>
    %130 = arith.truncf %129 : vector<8x8xf32> to vector<8x8xbf16>
    %c0_51 = arith.constant 0 : index
    %c0_52 = arith.constant 0 : index
    %c24 = arith.constant 24 : index
    %131 = vector.load %arg5[%c0_51, %c0_52, %c24] : memref<1x8x32xbf16, #tpu.memory_space<vmem>>, vector<1x8x8xbf16>
    %132 = vector.shape_cast %131 : vector<1x8x8xbf16> to vector<8x8xbf16>
    %133 = vector.shape_cast %130 : vector<8x8xbf16> to vector<1x8x8xbf16>
    tpu.vector_store %arg5[%c0_51, %c0_52, %c24], %133 {strides = array<i32>} : memref<1x8x32xbf16, #tpu.memory_space<vmem>>, vector<1x8x8xbf16>,
    return
  }
  func.func @transform_0(%arg0: i32, %arg1: i32) -> (i32, i32, i32) {
    %c0_i32 = arith.constant 0 : i32
    %c0_i32_0 = arith.constant 0 : i32
    return %arg1, %arg0, %c0_i32 : i32, i32, i32
  }
  func.func @transform_1(%arg0: i32, %arg1: i32) -> (i32, i32, i32) {
    %c0_i32 = arith.constant 0 : i32
    %c0_i32_0 = arith.constant 0 : i32
    %c0_i32_1 = arith.constant 0 : i32
    return %arg1, %c0_i32, %c0_i32_0 : i32, i32, i32
  }
  func.func @transform_2(%arg0: i32, %arg1: i32) -> (i32, i32, i32) {
    %c0_i32 = arith.constant 0 : i32
    %c0_i32_0 = arith.constant 0 : i32
    %c0_i32_1 = arith.constant 0 : i32
    return %arg1, %c0_i32, %c0_i32_0 : i32, i32, i32
  }
  func.func @transform_3(%arg0: i32, %arg1: i32) -> (i32, i32, i32) {
    %c0_i32 = arith.constant 0 : i32
    %c0_i32_0 = arith.constant 0 : i32
    return %arg1, %arg0, %c0_i32 : i32, i32, i32
  }
  func.func @transform_4(%arg0: i32, %arg1: i32) -> (i32, i32, i32, i32) {
    %c0_i32 = arith.constant 0 : i32
    %c0_i32_0 = arith.constant 0 : i32
    %c0_i32_1 = arith.constant 0 : i32
    return %arg1, %c0_i32, %arg0, %c0_i32_0 : i32, i32, i32, i32
  }
}

</mosaic_0001>

<bundles_post_ra>
// kernel: multi_head_attention.7
= control target key start
LH: loop header
LB: loop body
LE: loop exit
PB: predicated region body
PF: predicated region fallthrough
CT: control target
= control target key end

     0   :  { %8 = vsyncpa [#allocation4], 0  ;;  %s234_s0 = inlined_call_operand.vmem [shape: f32[16,32], index: 0, kind: input, shape index: {}]   ;;  %s235_s1 = inlined_call_operand.hbm [shape: bf16[32,32], index: 1, kind: input, shape index: {}]   ;;  %s236_s2 = inlined_call_operand.hbm [shape: f32[1,32], index: 2, kind: input, shape index: {}]   ;;  %s237_s3 = inlined_call_operand.vmem [shape: bf16[16,32], index: 3, kind: output, shape index: {}]  }
   0x1   :  { %s16_s14 = sshll.u32 %s235_s1, 4  ;;  %s17_s14 = int_to_ptr.hbm [resolvable:$true] %s16_s14 }
   0x2   :  { %9 = vsyncpa [#allocation6], 0  ;;  %s186_s15 = smov [#allocation3]   ;;  %s30_s19 = sshll.u32 %s236_s2, 4  ;;  %s31_s19 = int_to_ptr.hbm [resolvable:$true] %s30_s19 }
   0x3   :  { %s18_s16 = sshll.u32 %s186_s15, 4  ;;  %s187_s20 = smov 64   ;;  %s19_s16 = int_to_ptr.vmem [resolvable:$true] %s18_s16 }
   0x4   :  { %s188_s21 = smov 4   ;;  %s189_s22 = smov [#allocation5]  }
   0x5   :  { %24 = dma.hbm_to_vmem [thread:$0]  %s17_s14, 256, %s19_s16, [#allocation4], %s187_s20, %s187_s20, %s188_s21  }
   0x6   :  { %s32_s23 = sshll.u32 %s189_s22, 4  ;;  %s33_s23 = int_to_ptr.vmem [resolvable:$true] %s32_s23 }
   0x7   :  { %35 = dma.hbm_to_vmem [thread:$0]  %s31_s19, 16, %s33_s23, [#allocation6]  }
   0x8   :  { %182 = dma.done.wait [#allocation4], 256  }
   0x9   :  { %183 = vsyncadd [#allocation4], 4294967040 }
   0xa   :  { %184 = dma.done.wait [#allocation6], 16  }
   0xb   :  { %185 = vsyncadd [#allocation6], 4294967280  ;;  %vm49_vm0 = vcmask 261120   ;;  %v190_v0 = vmov 0.0   ;;  %v127_v1 = vld [vmem:[#allocation3 + $0x8] sm:$0xff]  ;;  %v126_v2 = vld [vmem:[#allocation3] sm:$0xff] }
   0xc   :  { %50 = vst.msk [vmem:[#allocation2] sm:$0xff] %vm49_vm0, %v190_v0  ;;  %83 = vmatpush.bf16.msra.mxu0 %v127_v1  ;;  %v54_v3 = vld [vmem:[%s234_s0] sm:$0xff]  ;;  %v55_v4 = vld [vmem:[%s234_s0 + $0x8] sm:$0xff]  ;;  %vm108_vm1 = vcmask 257024  }
   0xd   :  { %51 = vst.msk [vmem:[#allocation2 + $0x8] sm:$0xff] %vm49_vm0, %v190_v0  ;;  %v56_v5 = vpack.c.bf16 %v55_v4, %v54_v3  ;;  %v133_v10 = vld [vmem:[#allocation5] ss:$0 sm:$0xff] }
  0x10   :  { %84 = vmatpush.bf16.msra.mxu0 %v126_v2 }
  0x13   :  { %125 = vmatmul.msk.bf16.vlgmr.msra.gmra.mxu0 %vm49_vm0, %v56_v5  ;;  %v52_v6 = vld [vmem:[#allocation2] sm:$0xff] }
  0x14   :  { %v53_v9 = vld [vmem:[#allocation2 + $0x8] sm:$0xff] }
  0x90   :  { %v86_v7 = vpop.f32.mrf.mxu0 }
  0x91   :  { %v91_v8 = vadd.f32 %v86_v7, %v52_v6 }
  0x93   :  { %93 = vst.msk [vmem:[#allocation2] sm:$0xff] %vm49_vm0, %v91_v8 }
  0x98   :  { %v88_v11 = vpop.f32.mrf.mxu0 }
  0x99   :  { %v92_v12 = vadd.f32 %v88_v11, %v53_v9 }
  0x9a   :  { %v98_v13 = vld [vmem:[#allocation2] sm:$0xff] }
  0x9b   :  { %v104_v14 = vadd.f32 %v133_v10, %v98_v13  ;;  %94 = vst.msk [vmem:[#allocation2 + $0x8] sm:$0xff] %vm49_vm0, %v92_v12 }
  0x9d   :  { %v106_v15 = vpack.c.bf16 %v104_v14, %v104_v14 }
  0x9f   :  { %109 = vst.msk [vmem:[%s237_s3] sm:$0xf] %vm108_vm1, %v106_v15 }
  0xa2   :  { %v99_v16 = vld [vmem:[#allocation2 + $0x8] sm:$0xff] }
  0xa3   :  { %v105_v17 = vadd.f32 %v133_v10, %v99_v16 }
  0xa5   :  { %v107_v18 = vpack.c.bf16 %v105_v17, %v105_v17 }
  0xa7   :  { %110 = vst.msk [vmem:[%s237_s3 + $0x4] sm:$0xf] %vm108_vm1, %v107_v18 }
  0xa8   :  { %115 = vsyncpa [#allocation4], 1 }
  0xa9   :  { %116 = vsyncpa [#allocation6], 1 }

// kernel: multi_head_attention.9
= control target key start
LH: loop header
LB: loop body
LE: loop exit
PB: predicated region body
PF: predicated region fallthrough
CT: control target
= control target key end

     0   :  { %8 = vsyncpa [#allocation4], 0  ;;  %s240_s0 = inlined_call_operand.vmem [shape: bf16[16,32], index: 0, kind: input, shape index: {}]   ;;  %s241_s1 = inlined_call_operand.hbm [shape: bf16[32,32], index: 1, kind: input, shape index: {}]   ;;  %s242_s2 = inlined_call_operand.vmem [shape: f32[1,32], index: 2, kind: input, shape index: {}]   ;;  %s243_s3 = inlined_call_operand.hbm [shape: f32[16,32], index: 3, kind: output, shape index: {}]  }
   0x1   :  { %9 = vsyncpa [#allocation5], 0  ;;  %s16_s14 = sshll.u32 %s241_s1, 4  ;;  %s194_s15 = smov [#allocation3]   ;;  %s17_s14 = int_to_ptr.hbm [resolvable:$true] %s16_s14 }
   0x2   :  { %s18_s16 = sshll.u32 %s194_s15, 4  ;;  %s195_s17 = smov 64   ;;  %s19_s16 = int_to_ptr.vmem [resolvable:$true] %s18_s16 }
   0x3   :  { %s196_s18 = smov 4  }
   0x4   :  { %24 = dma.hbm_to_vmem [thread:$0]  %s17_s14, 256, %s19_s16, [#allocation4], %s195_s17, %s195_s17, %s196_s18  }
   0x5   :  { %190 = dma.done.wait [#allocation4], 256  }
   0x6   :  { %191 = vsyncadd [#allocation4], 4294967040  ;;  %vm36_vm0 = vcmask 261120   ;;  %v197_v0 = vmov 0.0   ;;  %v133_v1 = vld [vmem:[#allocation3 + $0x8] sm:$0xff]  ;;  %v132_v2 = vld [vmem:[#allocation3] sm:$0xff] }
   0x7   :  { %37 = vst.msk [vmem:[#allocation2] sm:$0xff] %vm36_vm0, %v197_v0  ;;  %74 = vmatpush.bf16.msra.mxu0 %v133_v1  ;;  %v131_v3 = vld [vmem:[%s240_s0] sm:$0xff]  ;;  %s198_s0 = smov [#allocation6]   ;;  %s105_s25 = sshll.u32 %s243_s3, 4  ;;  %s106_s25 = int_to_ptr.hbm [resolvable:$true] %s105_s25 }
   0x8   :  { %38 = vst.msk [vmem:[#allocation2 + $0x8] sm:$0xff] %vm36_vm0, %v197_v0  ;;  %v141_v8 = vld [vmem:[%s242_s2] ss:$0 sm:$0xff]  ;;  %s103_s22 = sshll.u32 %s198_s0, 4  ;;  %s199_s2 = smov 128   ;;  %s104_s22 = int_to_ptr.vmem [resolvable:$true] %s103_s22 }
   0x9   :  { %s200_s26 = smov 8  }
   0xb   :  { %75 = vmatpush.bf16.msra.mxu0 %v132_v2 }
   0xe   :  { %130 = vmatmul.msk.bf16.vlgmr.msra.gmra.mxu0 %vm36_vm0, %v131_v3  ;;  %v39_v4 = vld [vmem:[#allocation2] sm:$0xff] }
   0xf   :  { %v40_v7 = vld [vmem:[#allocation2 + $0x8] sm:$0xff] }
  0x8b   :  { %v77_v5 = vpop.f32.mrf.mxu0 }
  0x8c   :  { %v82_v6 = vadd.f32 %v77_v5, %v39_v4 }
  0x8e   :  { %84 = vst.msk [vmem:[#allocation2] sm:$0xff] %vm36_vm0, %v82_v6 }
  0x93   :  { %v79_v9 = vpop.f32.mrf.mxu0 }
  0x94   :  { %v83_v10 = vadd.f32 %v79_v9, %v40_v7 }
  0x95   :  { %v89_v11 = vld [vmem:[#allocation2] sm:$0xff] }
  0x96   :  { %85 = vst.msk [vmem:[#allocation2 + $0x8] sm:$0xff] %vm36_vm0, %v83_v10  ;;  %v95_v12 = vadd.f32 %v141_v8, %v89_v11 }
  0x98   :  { %97 = vst.msk [vmem:[#allocation6] sm:$0xff] %vm36_vm0, %v95_v12 }
  0x9d   :  { %v90_v13 = vld [vmem:[#allocation2 + $0x8] sm:$0xff] }
  0x9e   :  { %v96_v14 = vadd.f32 %v141_v8, %v90_v13 }
  0xa0   :  { %98 = vst.msk [vmem:[#allocation6 + $0x8] sm:$0xff] %vm36_vm0, %v96_v14 }
  0xa1   :  { %111 = dma.vmem_to_hbm [thread:$0]  %s104_s22, 256, %s106_s25, [#allocation5], %s199_s2, %s199_s2, %s200_s26  }
  0xa2   :  { %192 = dma.done.wait [#allocation5], 256  }
  0xa3   :  { %193 = vsyncadd [#allocation5], 4294967040 }
  0xa4   :  { %116 = vsyncpa [#allocation4], 1 }
  0xa5   :  { %117 = vsyncpa [#allocation5], 1 }

// kernel: multi_head_attention.6
= control target key start
LH: loop header
LB: loop body
LE: loop exit
PB: predicated region body
PF: predicated region fallthrough
CT: control target
= control target key end

     0   :  { %8 = vsyncpa [#allocation4], 0  ;;  %s276_s0 = inlined_call_operand.hbm [shape: f32[16,32], index: 0, kind: input, shape index: {}]   ;;  %s277_s1 = inlined_call_operand.hbm [shape: bf16[32,32], index: 1, kind: input, shape index: {}]   ;;  %s278_s2 = inlined_call_operand.hbm [shape: f32[1,32], index: 2, kind: input, shape index: {}]   ;;  %s279_s3 = inlined_call_operand.vmem [shape: bf16[16,32], index: 3, kind: output, shape index: {}]  }
   0x1   :  { %9 = vsyncpa [#allocation6], 0  ;;  %s27_s14 = sshll.u32 %s277_s1, 4  ;;  %s228_s15 = smov [#allocation5]   ;;  %s28_s14 = int_to_ptr.hbm [resolvable:$true] %s27_s14 }
   0x2   :  { %s29_s16 = sshll.u32 %s228_s15, 4  ;;  %s14_s19 = sshll.u32 %s276_s0, 4  ;;  %s30_s16 = int_to_ptr.vmem [resolvable:$true] %s29_s16  ;;  %s15_s19 = int_to_ptr.hbm [resolvable:$true] %s14_s19 }
   0x3   :  { %s229_s20 = smov 64   ;;  %s230_s21 = smov 4  }
   0x4   :  { %35 = dma.hbm_to_vmem [thread:$0]  %s28_s14, 256, %s30_s16, [#allocation6], %s229_s20, %s229_s20, %s230_s21  }
   0x5   :  { %s231_s22 = smov [#allocation3]   ;;  %s232_s24 = smov 128  }
   0x6   :  { %s16_s23 = sshll.u32 %s231_s22, 4  ;;  %s233_s25 = smov 8   ;;  %s17_s23 = int_to_ptr.vmem [resolvable:$true] %s16_s23 }
   0x7   :  { %22 = dma.hbm_to_vmem [thread:$0]  %s15_s19, 256, %s17_s23, [#allocation4], %s232_s24, %s232_s24, %s233_s25  }
   0x8   :  { %s41_s27 = sshll.u32 %s278_s2, 4  ;;  %s234_s28 = smov [#allocation7]   ;;  %s42_s27 = int_to_ptr.hbm [resolvable:$true] %s41_s27 }
   0x9   :  { %s43_s29 = sshll.u32 %s234_s28, 4  ;;  %s44_s29 = int_to_ptr.vmem [resolvable:$true] %s43_s29 }
   0xa   :  { %46 = dma.hbm_to_vmem [thread:$0]  %s42_s27, 16, %s44_s29, [#allocation6]  }
   0xb   :  { %224 = dma.done.wait [#allocation4], 256  }
   0xc   :  { %225 = vsyncadd [#allocation4], 4294967040 }
   0xd   :  { %226 = dma.done.wait [#allocation6], 272  }
   0xe   :  { %227 = vsyncadd [#allocation6], 4294967024  ;;  %vm64_vm0 = vcmask 261120   ;;  %v235_v0 = vmov 0.0   ;;  %v142_v1 = vld [vmem:[#allocation5 + $0x8] sm:$0xff]  ;;  %v141_v2 = vld [vmem:[#allocation5] sm:$0xff] }
   0xf   :  { %65 = vst.msk [vmem:[#allocation2] sm:$0xff] %vm64_vm0, %v235_v0  ;;  %98 = vmatpush.bf16.msra.mxu0 %v142_v1  ;;  %v69_v3 = vld [vmem:[#allocation3] sm:$0xff]  ;;  %v70_v4 = vld [vmem:[#allocation3 + $0x8] sm:$0xff]  ;;  %vm123_vm1 = vcmask 257024  }
  0x10   :  { %66 = vst.msk [vmem:[#allocation2 + $0x8] sm:$0xff] %vm64_vm0, %v235_v0  ;;  %v71_v5 = vpack.c.bf16 %v70_v4, %v69_v3  ;;  %v151_v10 = vld [vmem:[#allocation7] ss:$0 sm:$0xff] }
  0x13   :  { %99 = vmatpush.bf16.msra.mxu0 %v141_v2 }
  0x16   :  { %140 = vmatmul.msk.bf16.vlgmr.msra.gmra.mxu0 %vm64_vm0, %v71_v5  ;;  %v67_v6 = vld [vmem:[#allocation2] sm:$0xff] }
  0x17   :  { %v68_v9 = vld [vmem:[#allocation2 + $0x8] sm:$0xff] }
  0x93   :  { %v101_v7 = vpop.f32.mrf.mxu0 }
  0x94   :  { %v106_v8 = vadd.f32 %v101_v7, %v67_v6 }
  0x96   :  { %108 = vst.msk [vmem:[#allocation2] sm:$0xff] %vm64_vm0, %v106_v8 }
  0x9b   :  { %v103_v11 = vpop.f32.mrf.mxu0 }
  0x9c   :  { %v107_v12 = vadd.f32 %v103_v11, %v68_v9 }
  0x9d   :  { %v113_v13 = vld [vmem:[#allocation2] sm:$0xff] }
  0x9e   :  { %v119_v14 = vadd.f32 %v151_v10, %v113_v13  ;;  %109 = vst.msk [vmem:[#allocation2 + $0x8] sm:$0xff] %vm64_vm0, %v107_v12 }
  0xa0   :  { %v121_v15 = vpack.c.bf16 %v119_v14, %v119_v14 }
  0xa2   :  { %124 = vst.msk [vmem:[%s279_s3] sm:$0xf] %vm123_vm1, %v121_v15 }
  0xa5   :  { %v114_v16 = vld [vmem:[#allocation2 + $0x8] sm:$0xff] }
  0xa6   :  { %v120_v17 = vadd.f32 %v151_v10, %v114_v16 }
  0xa8   :  { %v122_v18 = vpack.c.bf16 %v120_v17, %v120_v17 }
  0xaa   :  { %125 = vst.msk [vmem:[%s279_s3 + $0x4] sm:$0xf] %vm123_vm1, %v122_v18 }
  0xab   :  { %130 = vsyncpa [#allocation4], 1 }
  0xac   :  { %131 = vsyncpa [#allocation6], 1 }

// kernel: multi_head_attention.8
= control target key start
LH: loop header
LB: loop body
LE: loop exit
PB: predicated region body
PF: predicated region fallthrough
CT: control target
= control target key end

     0   :  { %10 = vsyncpa [#allocation3], 0  ;;  %s1107_s0 = inlined_call_operand.vmem [shape: bf16[2,8,32], index: 0, kind: input, shape index: {}]   ;;  %s1108_s1 = inlined_call_operand.vmem [shape: bf16[2,8,32], index: 1, kind: input, shape index: {}]   ;;  %s1109_s2 = inlined_call_operand.vmem [shape: bf16[2,8,32], index: 2, kind: input, shape index: {}]   ;;  %s1110_s3 = inlined_call_operand.vmem [shape: bf16[2,8,32], index: 3, kind: output, shape index: {0}]   ;;  %s1111_s4 = inlined_call_operand.hbm [shape: bf16[2,4,8,8], index: 4, kind: output, shape index: {1}]  }
   0x1   :  { %12 = vsyncpa [#allocation3 + $0x1], 0  ;;  %s935_s15 = smov 0   ;;  %s937_s16 = smov 0  }
   0x2   :  { %s939_s17 = smov 0   ;;  %s941_s18 = smov 0  }
   0x3   :  { %s943_s19 = smov 0   ;;  %s945_s20 = smov 0  }
   0x4 LB: > { %s716_s21 = sadd.s32 4294967295, %s900_s20   ;;  %s717_s22 = sadd.s32 4294967294, %s900_s20   ;;  %s900_s20 = sphi %s945_s20, %s18_s20   ;;  %s896_s19 = sphi %s943_s19, %s1118_s19   ;;  %s892_s18 = sphi %s941_s18, %s1117_s18   ;;  %s888_s17 = sphi %s939_s17, %s1116_s17   ;;  %s884_s16 = sphi %s937_s16, %s1115_s16   ;;  %s880_s15 = sphi %s935_s15, %s1114_s15  }
   0x5   : > { %s27_s23 = sadd.s32 1, %s896_s19  ;;  %s147_s24 = sadd.s32 1, %s888_s17 }
   0x6   : > { %p28_p0 = scmp.ge.s32.totalorder %s27_s23, 2  ;;  %p157_p1 = scmp.ne.s32.totalorder %s888_s17, %s884_s16 }
   0x7   : > { %p158_p2 = scmp.eq.s32.totalorder %s716_s21, 1  ;;  %p163_p3 = scmp.ne.s32.totalorder %s884_s16, %s880_s15 }
   0x8   : > { %s1120_s23 = smov (%p28_p0, %s27_s23), 0  ;;  %p164_p5 = scmp.eq.s32.totalorder %s717_s22, 1 }
   0x9   : > { %p975_p4 = por %p158_p2, %p157_p1  ;;  %s142_s26 = ssub.s32 %s896_s19, %s1120_s23 }
   0xa   : > { %p720_p6 = scmp.ge.s32.totalorder %s900_s20, 1  ;;  %p145_p7 = scmp.eq.s32.totalorder %s142_s26, 0 }
   0xb   : > { %p982_p8 = por %p164_p5, %p163_p3  ;;  %p206_p9 = scmp.lt.s32.totalorder %s900_s20, 3 }
   0xc   : > { %s988_s28 = scalar_select %p145_p7, %s888_s17, %s147_s24  }
   0xd   : > { %p207_p10 = pnand %p720_p6, %p206_p9 }
   0xe   : > { %p249_p11 = scmp.lt.s32.totalorder (!%p207_p10), %s892_s18, 1  ;;  %s902_s11 = smov (!%p207_p10), 120  }
   0xf   : > { %210 = sbr.rel (%p207_p10) target bundleno = 1093 (0x445), region = 32  ;;  %s903_s12 = smov (!%p207_p10), 112  }
  0x10   : > { %s904_s13 = smov (!%p207_p10), 104   ;;  %s246_s24 = sand.u32 (!%p207_p10), 1, %s884_s16  }
  0x11   : > { %s721_s26 = sshll.u32 (!%p207_p10), %s246_s24, 4  ;;  %s906_s8 = smov (!%p207_p10), 8  }
  0x12   : > { %s742_s9 = sshll.u32 (!%p207_p10), %s892_s18, 4  ;;  %s567_s21 = scalar_lea.sflag (!%p207_p10), [#allocation3], %s246_s24 }
  0x13   : > { %s842_s6 = scalar_lea.hbm (!%p207_p10), %s1111_s4, 32 }
  0x14   : > { %s250_s29 = scalar_select %p249_p11, %s892_s18, 1  ;;  %vm275_vm0 = vcmask 64512   ;;  %vm318_vm1 = vcmask 1043456   ;;  %vm313_vm2 = vcmask 60416  }
  0x16   : > { %s992_s30 = sshll.u32 %s250_s29, 2  ;;  %s1032_s29 = scalar_lea.vmem [#allocation2], %s721_s26 }
  0x17   : > { %s259_s7 = scalar_lea.vmem %s1108_s1, %s992_s30  ;;  %s255_s10 = scalar_lea.vmem %s1107_s0, %s992_s30 }
  0x18   : > { %v273_v0 = vld [vmem:[%s259_s7] sm:$0xf]  ;;  %s263_s22 = scalar_lea.vmem %s1109_s2, %s992_s30  ;;  %s1042_s7 = scalar_lea.vmem %s1110_s3, %s992_s30 }
  0x19   : > { %v280_v1 = vsel %vm275_vm0, %v273_v0, 0  ;;  %v343_v2 = vunpack.c.l.b16 %v273_v0  ;;  %v272_v4 = vld [vmem:[%s255_s10] sm:$0xf]  ;;  %s905_s30 = smov 24  }
  0x1a   : > { %289 = vmatpush.bf16.xpose.msra.mxu0 %v280_v1  ;;  %v338_v5 = vunpack.c.l.b16 %v272_v4  ;;  %v274_v25 = vld [vmem:[%s263_s22] sm:$0xf] }
  0x1b   : > { %v344_v3 = vpack.c.b16 %v343_v2, %v343_v2  ;;  %v320_v27 = vsel %vm318_vm1, %v274_v25, 0  ;;  %v387_v38 = vunpack.c.l.b16 %v274_v25 }
  0x1c   : > { %v339_v6 = vpack.c.b16 %v338_v5, %v338_v5  ;;  %329 = vmatpush.bf16.msra.mxu1 %v320_v27 }
  0x1d   : > { %345 = vrot.lane.b32.xlu1 %v344_v3, %s902_s11  ;;  %419 = vrot.lane.b32.xlu2 %v344_v3, %s903_s12  ;;  %v1025_v42 = vpack.c.b16 %v387_v38, %v387_v38 }
  0x21   : > { %726 = vmatmul.msk.bf16.vlgmr.msra.gmra.mxu0 %vm275_vm0, %v272_v4 }
  0x25   : > { %340 = vrot.lane.b32.xlu1 %v339_v6, %s902_s11  ;;  %490 = vrot.lane.b32.xlu2 %v344_v3, %s904_s13 }
  0x2d   : > { %488 = vrot.lane.b32.xlu1 %v339_v6, %s904_s13 }
  0x77   : > { %v420_v13 = vpop.permute.xlu2 %419 }
  0x78   : > { %v425_v26 = vsel %vm275_vm0, %v420_v13, 0 }
  0x79   : > { %434 = vmatpush.bf16.xpose.msrb.mxu1 %v425_v26 }
  0x7f   : > { %v491_v14 = vpop.permute.xlu2 %490 }
  0x80   : > { %v496_v15 = vsel %vm275_vm0, %v491_v14, 0 }
  0x81   : > { %505 = vmatpush.bf16.xpose.msrb.mxu0 %v496_v15 }
  0x8f   : > { %v346_v7 = vpop.permute.xlu1 %345 }
  0x90   : > { %v351_v8 = vsel %vm275_vm0, %v346_v7, 0 }
  0x91   : > { %360 = vmatpush.bf16.xpose.msra.mxu2 %v351_v8 }
  0x97   : > { %v341_v9 = vpop.permute.xlu1 %340 }
  0x98   : > { %728 = vmatmul.msk.bf16.vlgmr.msra.gmra.mxu2 %vm275_vm0, %v341_v9 }
  0x9e   : > { %v291_v10 = vpop.f32.mrf.mxu0 }
  0x9f   : > { %v295_v11 = vsel %vm275_vm0, %v291_v10, -inf  ;;  %v489_v16 = vpop.permute.xlu1 %488 }
  0xa0   : > { %296 = vmax.xlane.f32.xlu0 %v295_v11  ;;  %734 = vmatmul.msk.bf16.vlgmr.msrb.gmra.mxu0 %vm275_vm0, %v489_v16 }
  0xa6   : > { %v293_v12 = vpop.f32.mrf.mxu0 }
 0x113   : > { %v297_v17 = vpop.xlane.xlu0 %296 }
 0x114   : > { %v298_v18 = vsub.f32 %v291_v10, %v297_v17 }
 0x116   : > { %v299_v19 = vmul.f32 1.442695, %v298_v18 }
 0x118   : > { %806 = vpow2.f32 %v299_v19 }
 0x11b   : > { %v362_v20 = vpop.f32.mrf.mxu2 }
 0x11c   : > { %v366_v21 = vsel %vm275_vm0, %v362_v20, -inf }
 0x11d   : > { %367 = vmax.xlane.f32.xlu2 %v366_v21  ;;  %v507_v28 = vpop.f32.mrf.mxu0 }
 0x11e   : > { %v807_v22 = vpop.eup %806  ;;  %v511_v29 = vsel %vm275_vm0, %v507_v28, -inf }
 0x11f   : > { %v301_v23 = vsel %vm275_vm0, %v807_v22, 0.0 }
 0x120   : > { %302 = vadd.xlane.f32.xlu0 %v301_v23 }
 0x123   : > { %v364_v24 = vpop.f32.mrf.mxu2 }
 0x125   : > { %v509_v34 = vpop.f32.mrf.mxu0 }
 0x134   : > { %417 = vrot.lane.b32.xlu0 %v339_v6, %s903_s12 }
 0x15e   : > { %512 = vmax.xlane.f32.xlu0 %v511_v29 }
 0x172   : > { %531 = vrot.lane.b32.xlu0 %v1025_v42, %s904_s13  ;;  %s583_s13 = sshll.u32 %s1032_s29, 4  ;;  %s584_s13 = int_to_ptr.vmem [resolvable:$true] %s583_s13 }
 0x190   : > { %v368_v30 = vpop.xlane.xlu2 %367 }
 0x191   : > { %v369_v31 = vsub.f32 %v362_v20, %v368_v30 }
 0x193   : > { %v303_v32 = vpop.xlane.xlu0 %302  ;;  %v370_v33 = vmul.f32 1.442695, %v369_v31 }
 0x194   : > { %808 = vrcp.f32 %v303_v32 }
 0x195   : > { %810 = vpow2.f32 %v370_v33 }
 0x19a   : > { %v809_v35 = vpop.eup %808 }
 0x19b   : > { %v811_v36 = vpop.eup %810  ;;  %v305_v37 = vmul.f32 %v809_v35, %v303_v32 }
 0x19c   : > { %v372_v39 = vsel %vm275_vm0, %v811_v36, 0.0 }
 0x19d   : > { %v306_v40 = vsub.f32 2.0, %v305_v37  ;;  %373 = vadd.xlane.f32.xlu2 %v372_v39 }
 0x19f   : > { %v307_v41 = vmul.f32 %v809_v35, %v306_v40 }
 0x1a1   : > { %v308_v43 = vmul.f32 %v307_v41, %v303_v32 }
 0x1a3   : > { %v309_v44 = vsub.f32 2.0, %v308_v43 }
 0x1a5   : > { %v310_v45 = vmul.f32 %v309_v44, %v307_v41 }
 0x1a6   : > { %v418_v48 = vpop.permute.xlu0 %417 }
 0x1a7   : > { %v311_v46 = vmul.f32 %v807_v22, %v310_v45 }
 0x1a9   : > { %v312_v47 = vpack.c.bf16 %v311_v46, %v311_v46 }
 0x1ab   : > { %314 = vst.msk [vmem:[%s1032_s29] sm:$0xf] %vm313_vm2, %v312_v47  ;;  %727 = vmatmul.msk.bf16.vlgmr.msra.gmra.mxu1 %vm275_vm0, %v312_v47 }
 0x1bb   : > { %731 = vmatmul.msk.bf16.vlgmr.msrb.gmra.mxu1 %vm275_vm0, %v418_v48 }
 0x1d1   : > { %v513_v61 = vpop.xlane.xlu0 %512 }
 0x1d2   : > { %v514_v62 = vsub.f32 %v507_v28, %v513_v61 }
 0x1d4   : > { %v515_v0 = vmul.f32 1.442695, %v514_v62 }
 0x1e4   : > { %v532_v6 = vpop.permute.xlu0 %531 }
 0x1e5   : > { %v537_v7 = vsel %vm318_vm1, %v532_v6, 0 }
 0x1e6   : > { %546 = vmatpush.bf16.msrb.mxu2 %v537_v7 }
 0x210   : > { %v374_v49 = vpop.xlane.xlu2 %373 }
 0x211   : > { %812 = vrcp.f32 %v374_v49 }
 0x212   : > { %814 = vpow2.f32 %v515_v0 }
 0x217   : > { %v813_v50 = vpop.eup %812 }
 0x218   : > { %v376_v51 = vmul.f32 %v813_v50, %v374_v49  ;;  %v815_v3 = vpop.eup %814 }
 0x219   : > { %v517_v4 = vsel %vm275_vm0, %v815_v3, 0.0 }
 0x21a   : > { %v377_v52 = vsub.f32 2.0, %v376_v51 }
 0x21c   : > { %v378_v53 = vmul.f32 %v813_v50, %v377_v52 }
 0x21e   : > { %v379_v54 = vmul.f32 %v378_v53, %v374_v49 }
 0x220   : > { %v380_v55 = vsub.f32 2.0, %v379_v54 }
 0x222   : > { %v381_v56 = vmul.f32 %v380_v55, %v378_v53 }
 0x224   : > { %v382_v57 = vmul.f32 %v811_v36, %v381_v56 }
 0x226   : > { %v383_v58 = vpack.c.bf16 %v382_v57, %v382_v57 }
 0x228   : > { %v331_v59 = vpop.f32.mrf.mxu1  ;;  %729 = vst.msk [vmem:[%s1032_s29 + $0x4] sm:$0xf] %vm313_vm2, %v383_v58 }
 0x229   : > { %v335_v60 = vpack.c.bf16 %v331_v59, %v331_v59 }
 0x22b   : > { %336 = vst.msk [vmem:[%s1042_s7] sm:$0xf] %vm313_vm2, %v335_v60 }
 0x230   : > { %v333_v63 = vpop.f32.mrf.mxu1 }
 0x238   : > { %v436_v1 = vpop.f32.mrf.mxu1 }
 0x239   : > { %v440_v2 = vsel %vm275_vm0, %v436_v1, -inf }
 0x23a   : > { %441 = vmax.xlane.f32.xlu1 %v440_v2 }
 0x240   : > { %v438_v5 = vpop.f32.mrf.mxu1 }
 0x242   : > { %518 = vadd.xlane.f32.xlu1 %v517_v4 }
 0x25b   : > { %460 = vrot.lane.b32.xlu1 %v1025_v42, %s903_s12  ;;  %s582_s12 = scalar_lea.hbm %s1111_s4, %s742_s9 }
 0x25c   : > { %s585_s14 = sshll.u32 %s582_s12, 4  ;;  %s586_s14 = int_to_ptr.hbm [resolvable:$true] %s585_s14 }
 0x25d   : > { %s836_s22 = sshra.s32 %s586_s14, 4  ;;  %s837_s22 = int_to_ptr.hbm [resolvable:$true] %s836_s22 }
 0x25e   : > { %s838_s26 = scalar_lea.hbm %s837_s22, 16  ;;  %p843_p1 = scmp.lt.s32.totalorder %s837_s22, %s1111_s4 }
 0x25f   : > { %p839_p12 = scmp.ne.s32.totalorder %s837_s22, %s838_s26  ;;  %p844_p2 = scmp.lt.s32.totalorder %s842_s6, %s838_s26 }
 0x261   : > { %p840_p13 = pnand %p839_p12, %p975_p4  ;;  %p845_p3 = por %p844_p2, %p843_p1 }
 0x263   : > { %p841_p0 = pneg %p840_p13 }
 0x265   : > { %p846_p5 = pnand %p845_p3, %p841_p0 }
 0x2ad   : > { %v442_v8 = vpop.xlane.xlu1 %441 }
 0x2ae   : > { %v443_v9 = vsub.f32 %v436_v1, %v442_v8 }
 0x2b0   : > { %v444_v10 = vmul.f32 1.442695, %v443_v9 }
 0x2b2   : > { %816 = vpow2.f32 %v444_v10 }
 0x2b5   : > { %v519_v11 = vpop.xlane.xlu1 %518 }
 0x2b6   : > { %818 = vrcp.f32 %v519_v11 }
 0x2b8   : > { %v817_v12 = vpop.eup %816 }
 0x2b9   : > { %v446_v13 = vsel %vm275_vm0, %v817_v12, 0.0 }
 0x2ba   : > { %447 = vadd.xlane.f32.xlu2 %v446_v13 }
 0x2bc   : > { %v819_v14 = vpop.eup %818 }
 0x2bd   : > { %v521_v15 = vmul.f32 %v819_v14, %v519_v11 }
 0x2bf   : > { %v522_v16 = vsub.f32 2.0, %v521_v15 }
 0x2c1   : > { %v523_v17 = vmul.f32 %v819_v14, %v522_v16 }
 0x2c3   : > { %v524_v18 = vmul.f32 %v523_v17, %v519_v11 }
 0x2c5   : > { %v525_v19 = vsub.f32 2.0, %v524_v18 }
 0x2c7   : > { %v526_v20 = vmul.f32 %v525_v19, %v523_v17 }
 0x2c9   : > { %v527_v21 = vmul.f32 %v815_v3, %v526_v20 }
 0x2cb   : > { %v528_v22 = vpack.c.bf16 %v527_v21, %v527_v21 }
 0x2cd   : > { %735 = vst.msk [vmem:[%s1032_s29 + $0xc] sm:$0xf] %vm313_vm2, %v528_v22  ;;  %736 = vmatmul.msk.bf16.vlgmr.msrb.gmra.mxu2 %vm275_vm0, %v528_v22  ;;  %v461_v24 = vpop.permute.xlu1 %460 }
 0x2ce   : > { %v466_v28 = vsel %vm318_vm1, %v461_v24, 0 }
 0x2d2   : > { %389 = vrot.lane.b32.xlu2 %v1025_v42, %s902_s11 }
 0x32d   : > { %v448_v23 = vpop.xlane.xlu2 %447 }
 0x32e   : > { %820 = vrcp.f32 %v448_v23 }
 0x334   : > { %v821_v25 = vpop.eup %820 }
 0x335   : > { %v450_v26 = vmul.f32 %v821_v25, %v448_v23  ;;  %v390_v27 = vpop.permute.xlu2 %389 }
 0x336   : > { %v395_v29 = vsel %vm318_vm1, %v390_v27, 0 }
 0x337   : > { %v451_v30 = vsub.f32 2.0, %v450_v26  ;;  %404 = vmatpush.bf16.msra.mxu3 %v395_v29 }
 0x339   : > { %v452_v31 = vmul.f32 %v821_v25, %v451_v30 }
 0x33a   : > { %730 = vmatmul.msk.bf16.vlgmr.msra.gmra.mxu3 %vm275_vm0, %v383_v58 }
 0x33b   : > { %475 = vmatpush.bf16.msrb.mxu3 %v466_v28  ;;  %v453_v32 = vmul.f32 %v452_v31, %v448_v23 }
 0x33d   : > { %v454_v33 = vsub.f32 2.0, %v453_v32 }
 0x33f   : > { %v455_v34 = vmul.f32 %v454_v33, %v452_v31 }
 0x341   : > { %v456_v35 = vmul.f32 %v817_v12, %v455_v34 }
 0x343   : > { %v457_v36 = vpack.c.bf16 %v456_v35, %v456_v35 }
 0x345   : > { %732 = vst.msk [vmem:[%s1032_s29 + $0x8] sm:$0xf] %vm313_vm2, %v457_v36 }
 0x34a   : > { %733 = vmatmul.msk.bf16.vlgmr.msrb.gmra.mxu3 %vm275_vm0, %v457_v36 }
 0x350   : > { %v548_v37 = vpop.f32.mrf.mxu2 }
 0x351   : > { %v552_v38 = vpack.c.bf16 %v548_v37, %v548_v37 }
 0x353   : > { %554 = vrot.lane.b32.xlu1 %v552_v38, %s905_s30 }
 0x358   : > { %v550_v39 = vpop.f32.mrf.mxu2 }
 0x3bd   : > { %v406_v40 = vpop.f32.mrf.mxu3 }
 0x3be   : > { %v410_v41 = vpack.c.bf16 %v406_v40, %v406_v40 }
 0x3c0   : > { %412 = vrot.lane.b32.xlu2 %v410_v41, %s906_s8 }
 0x3c5   : > { %v408_v42 = vpop.f32.mrf.mxu3 }
 0x3c6   : > { %849 = shalt.err (!%p846_p5)
}
 0x3c7   : > { %s907_s24 = smov 64   ;;  %s908_s29 = smov 4   ;;  %vm415_vm3 = vcmask 126016   ;;  %vm486_vm4 = vcmask 191616   ;;  %vm557_vm5 = vcmask 257216   ;;  %v555_v48 = vpop.permute.xlu1 %554 }
 0x3c8   : > { %743 = dma.vmem_to_hbm [thread:$0]  (%p975_p4), %s584_s13, 256, %s586_s14, %s567_s21, %s907_s24, %s907_s24, %s908_s29  }
 0x3c9   : > { %s909_s9 = smov 16  }
 0x3cd   : > { %v477_v43 = vpop.f32.mrf.mxu3 }
 0x3ce   : > { %v481_v44 = vpack.c.bf16 %v477_v43, %v477_v43 }
 0x3d0   : > { %483 = vrot.lane.b32.xlu0 %v481_v44, %s909_s9 }
 0x3d5   : > { %v479_v45 = vpop.f32.mrf.mxu3 }
 0x41a   : > { %v413_v46 = vpop.permute.xlu2 %412 }
 0x41b   : > { %416 = vst.msk [vmem:[%s1042_s7] sm:$0xf] %vm415_vm3, %v413_v46 }
 0x442   : > { %v484_v47 = vpop.permute.xlu0 %483 }
 0x443   : > { %487 = vst.msk [vmem:[%s1042_s7] sm:$0xf] %vm486_vm4, %v484_v47 }
 0x444   : > { %558 = vst.msk [vmem:[%s1042_s7] sm:$0xf] %vm557_vm5, %v555_v48 }
 0x445 PF: > { %p749_p6 = scmp.ge.s32.totalorder %s900_s20, 2  ;;  %s610_s25 = sand.u32 1, %s880_s15  }
 0x446   : > { %s611_s10 = scalar_lea.sflag [#allocation3], %s610_s25 }
 0x447   : > { %p746_p4 = pnand %p749_p6, %p982_p8 }
 0x449   : > { %p747_p7 = pneg %p746_p4 }
 0x44b   : > { %875 = dma.done.wait (%p747_p7), %s611_s10, 256  }
 0x44c   : > { %877 = vsyncadd (%p747_p7), %s611_s10, 4294967040  ;;  %s18_s20 = sadd.s32 1, %s900_s20   ;;  %s1114_s15 = smov %s884_s16 }
 0x44d   : > { %p15_p9 = scmp.ge.s32.totalorder %s18_s20, 4   ;;  %s1115_s16 = smov %s888_s17 }
 0x44e   : > { %s1116_s17 = smov %s988_s28  ;;  %s1117_s18 = smov %s896_s19 }
 0x44f   : > { %s1118_s19 = smov %s1120_s23  ;;  %17 = sbr.rel (!%p15_p9) target bundleno = 4 (0x4), region = 88 }
 0x454   :  { %617 = vsyncpa [#allocation3], 1 }
 0x455   :  { %619 = vsyncpa [#allocation3 + $0x1], 1 }

</bundles_post_ra>
